<compile_context>
chip_gen: v7x
topology: tpu7x:2x2x1
jax: 0.10.0
libtpu: 0.0.40
codegen_flags: <defaults>
</compile_context>

<pallas_src>
import functools

import jax
import jax.numpy as jnp
from jax.experimental import pallas as pl
from jax.experimental.pallas import tpu as pltpu


def _round_up(x, m):
    return (x + m - 1) // m * m


# ----------------------------- Pallas kernel ------------------------------ #
def wide_deep_kernel(xT_ref, wide_ref, w1T_ref, b1T_ref, w2T_ref, b2T_ref,
                     w3T_ref, out_ref):
    """One batch tile (TB lanes, batch on the lane axis) of WideDeep forward.

    xT_ref  : (Dd+Ds, TB) bf16  concat([x_dense, sparse_embed]) transposed
    wide_ref: (1, TB)     f32   full wide logit (dense + one-hot) + b3
    w*/b*   :                   pre-transposed weights, VMEM-resident
    out_ref : (1, TB)     f32   sigmoid(wide + deep), lane-dense store
    """
    xT = xT_ref[...]

    # deep layer 1 (single concat-free dot):  h1^T = w1^T @ x^T + b1^T
    h1 = jnp.dot(w1T_ref[...], xT, preferred_element_type=jnp.float32) + b1T_ref[...]
    h1 = jnp.maximum(h1, 0.0).astype(jnp.bfloat16)

    # deep layer 2
    h2 = jnp.dot(w2T_ref[...], h1, preferred_element_type=jnp.float32) + b2T_ref[...]
    h2 = jnp.maximum(h2, 0.0).astype(jnp.bfloat16)

    # deep output row (1, TB); wide logit (+ b3) was precomputed in f32
    deep = jnp.dot(w3T_ref[...], h2, preferred_element_type=jnp.float32)
    out_ref[...] = jax.nn.sigmoid(deep + wide_ref[...])   # EUP exp, unmasked store


# ------------------------------ kernel wrapper ----------------------------- #
def _choose_tile(batch, tb_max, target_steps):
    """Largest 128-multiple lane tile that still leaves ~target_steps grid steps
    (keeps the pipeline fed and gives v7x's 2 TensorCores several steps each)."""
    assert tb_max >= 128 and tb_max % 128 == 0, "tb_max must be a multiple of 128"
    tb = _round_up(pl.cdiv(batch, target_steps), 128)
    return max(128, min(tb, tb_max, _round_up(batch, 128)))


def wide_deep_forward(xT, wide, w1T, b1T, w2T, b2T, w3T, *,
                      tb_max=2048, target_steps=8):
    """Batch-tiled fused forward.  xT: (D, B) bf16 slab, wide: (B,) f32 logit."""
    D, B = xT.shape
    H2 = w1T.shape[0]
    H4 = w2T.shape[0]

    TB = _choose_tile(B, tb_max, target_steps)
    Bp = _round_up(B, TB)
    pad = Bp - B
    if pad:                                    # single bf16 copy, fused under jit
        xT = jnp.pad(xT, ((0, 0), (0, pad)))
        wide = jnp.pad(wide, ((0, pad),))
    wide = wide.reshape(1, Bp)

    grid = (Bp // TB,)

    def stream(feat):                          # streamed batch tiles (double-buffered)
        return pl.BlockSpec((feat, TB), lambda i: (0, i))

    def resident(shape):                       # block index never changes ->
        return pl.BlockSpec(shape, lambda i: (0, 0),      # single-buffer the weights
                            pipeline_mode=pl.Buffered(1))

    out = pl.pallas_call(
        wide_deep_kernel,
        out_shape=jax.ShapeDtypeStruct((1, Bp), jnp.float32),
        grid=grid,
        in_specs=[
            stream(D),            # xT            (Dd+Ds, TB)
            stream(1),            # wide logit    (1, TB)
            resident((H2, D)),    # w1^T
            resident((H2, 1)),    # b1^T
            resident((H4, H2)),   # w2^T
            resident((H4, 1)),    # b2^T
            resident((1, H4)),    # w3^T
        ],
        out_specs=pl.BlockSpec((1, TB), lambda i: (0, i)),
        compiler_params=pltpu.CompilerParams(
            dimension_semantics=("parallel",),        # v7x: batch tiles across 2 TCs
            vmem_limit_bytes=48 * 1024 * 1024),       # > v5e/v6e defaults, < v7x 64 MiB
    )(xT, wide, w1T, b1T, w2T, b2T, w3T)

    return out[0, :B].reshape(B, 1)


# ------------------------------ parameter prep ----------------------------- #
def make_params(key, dense_field, field_feat_nums, k):
    """Deterministic parameter init; shapes match the PyTorch module."""
    sparse_field = len(field_feat_nums)
    sparse_dims = sparse_field * k
    one_hot_dim = sum(field_feat_nums)
    wide_dim = one_hot_dim + dense_field
    H = dense_field + sparse_dims              # deep hidden_units
    H2, H4 = H // 2, H // 4
    keys = jax.random.split(key, 5)

    def xavier(kk, shape):
        lim = (6.0 / (shape[0] + shape[1])) ** 0.5
        return jax.random.uniform(kk, shape, jnp.float32, -lim, lim)

    return {
        "emb_table": xavier(keys[0], (one_hot_dim, k)),   # stacked embedding tables
        "w_wide": xavier(keys[1], (wide_dim, 1)),
        "w1": xavier(keys[2], (H, H2)),
        "b1": jnp.zeros((1, H2), jnp.float32),
        "w2": xavier(keys[3], (H2, H4)),
        "b2": jnp.zeros((1, H4), jnp.float32),
        "w3": xavier(keys[4], (H4, 1)),
        "b3": jnp.zeros((1, 1), jnp.float32),
    }


def prepare_params(params, dense_field, field_feat_nums, k):
    """One-time layout prep (outside the per-batch path):
      * embedding table pre-transposed to (k, one_hot_dim) bf16 so the lookup
        writes the activation slab directly in the kernel's transposed layout
      * w1's sparse rows permuted once to match that (k-major, field-minor) order
      * matmul weights pre-transposed to (out, in) bf16; biases as (out, 1) f32
      * wide weights kept f32 (the wide logit stays f32 end-to-end)
    """
    sparse_field = len(field_feat_nums)
    Dd = dense_field
    offs = [0]
    for n in field_feat_nums[:-1]:
        offs.append(offs[-1] + n)

    # new deep-input row Dd + d*sparse_field + f  <-  old row Dd + f*k + d
    perm = (jnp.arange(k)[:, None] + jnp.arange(sparse_field)[None, :] * k).reshape(-1)
    w1_rows = jnp.concatenate([params["w1"][:Dd], params["w1"][Dd:][perm]], axis=0)

    return {
        "offsets": jnp.asarray(offs, jnp.int32),                    # (sparse_field,)
        "emb_t": params["emb_table"].T.astype(jnp.bfloat16),        # (k, one_hot_dim)
        "w_wide_dense": params["w_wide"][:Dd, 0],                   # (Dd,)          f32
        "w_wide_onehot": params["w_wide"][Dd:, 0],                  # (one_hot_dim,) f32
        "b3": params["b3"][0, 0],                                   # ()             f32
        "w1T": w1_rows.T.astype(jnp.bfloat16),                      # (H2, Dd+Ds)
        "b1T": params["b1"].reshape(-1, 1).astype(jnp.float32),     # (H2, 1)
        "w2T": params["w2"].T.astype(jnp.bfloat16),                 # (H4, H2)
        "b2T": params["b2"].reshape(-1, 1).astype(jnp.float32),     # (H4, 1)
        "w3T": params["w3"].T.astype(jnp.bfloat16),                 # (1, H4)
    }


# ------------------------------- model glue -------------------------------- #
@functools.partial(jax.jit, static_argnames=("dense_field", "sparse_field", "k",
                                             "assume_one_hot", "tb_max",
                                             "target_steps"))
def wide_deep_apply(x, prep, *, dense_field, sparse_field, k,
                    assume_one_hot=True, tb_max=2048, target_steps=8):
    """Slices x, does the gather glue in JAX (fused under jit), calls the kernel."""
    B = x.shape[0]
    Dd = dense_field
    x_dense = x[:, :Dd]
    x_sparse = x[:, Dd:Dd + sparse_field].astype(jnp.int32)
    one_hot = x[:, Dd + sparse_field:]

    idx = x_sparse + prep["offsets"][None, :]              # (B, sparse_field)

    # Full wide logit + b3 as one f32 per-row scalar: no streamed one-hot
    # matmul, no tiny M=1 dot in the kernel, no bf16 rounding of the wide term.
    if assume_one_hot:
        # valid when the one-hot block is exactly single-hot & consistent with idx
        wide_oh = prep["w_wide_onehot"][idx].sum(axis=1)   # (B,)
    else:
        wide_oh = one_hot @ prep["w_wide_onehot"]          # exact original semantics
    wide = x_dense @ prep["w_wide_dense"] + wide_oh + prep["b3"]     # (B,) f32

    # Deep-input slab directly in kernel layout: (Dd+Ds, B) bf16, batch on lanes.
    # The gather reads the pre-transposed bf16 table, so no (B, Ds) f32
    # intermediate and no extra transpose/cast pass over the activations.
    xsT = prep["emb_t"][:, idx.T].reshape(k * sparse_field, B)       # (Ds, B) bf16
    xT = jnp.concatenate([x_dense.T.astype(jnp.bfloat16), xsT], axis=0)

    return wide_deep_forward(xT, wide, prep["w1T"], prep["b1T"], prep["w2T"],
                             prep["b2T"], prep["w3T"],
                             tb_max=tb_max, target_steps=target_steps)


# ------------------------------- reference --------------------------------- #
def wide_deep_ref(x, params, dense_field, field_feat_nums, k):
    """Pure-JAX f32 reference, faithful to the PyTorch forward."""
    sparse_field = len(field_feat_nums)
    x_dense = x[:, :dense_field]
    x_sparse = x[:, dense_field:dense_field + sparse_field].astype(jnp.int32)
    one_hot = x[:, dense_field + sparse_field:]
    wide_input = jnp.concatenate([x_dense, one_hot], axis=-1)
    wide_out = wide_input @ params["w_wide"]
    offs = [0]
    for n in field_feat_nums[:-1]:
        offs.append(offs[-1] + n)
    offsets = jnp.asarray(offs, jnp.int32)
    sparse_embed = params["emb_table"][x_sparse + offsets[None, :]].reshape(
        x.shape[0], sparse_field * k)
    deep_input = jnp.concatenate([x_dense, sparse_embed], axis=-1)
    h1 = jax.nn.relu(deep_input @ params["w1"] + params["b1"])
    h2 = jax.nn.relu(h1 @ params["w2"] + params["b2"])
    deep_out = h2 @ params["w3"] + params["b3"]
    return jax.nn.sigmoid(wide_out + deep_out)


# ---------------------------------- main ------------------------------------ #
if __name__ == "__main__":
    # small, deterministic config (exercises a 4-step batch grid + ragged pad)
    dense_field = 8
    field_feat_nums = [10, 10, 10, 10]   # 4 sparse fields
    k = 8                                # embedding dim
    sparse_field = len(field_feat_nums)
    B = 500                              # -> TB=128, Bp=512, grid=(4,), pad=12

    key = jax.random.PRNGKey(0)
    k_params, k_dense, k_idx = jax.random.split(key, 3)

    params = make_params(k_params, dense_field, field_feat_nums, k)
    prep = prepare_params(params, dense_field, field_feat_nums, k)

    # build input x = [dense | sparse indices (as float) | one-hot]
    x_dense = jax.random.uniform(k_dense, (B, dense_field), jnp.float32)
    idx_keys = jax.random.split(k_idx, sparse_field)
    sparse_idx = jnp.stack(
        [jax.random.randint(idx_keys[i], (B,), 0, field_feat_nums[i])
         for i in range(sparse_field)], axis=1)            # (B, sparse_field)
    one_hot = jnp.concatenate(
        [jax.nn.one_hot(sparse_idx[:, i], field_feat_nums[i], dtype=jnp.float32)
         for i in range(sparse_field)], axis=-1)           # (B, 40)
    x = jnp.concatenate([x_dense, sparse_idx.astype(jnp.float32), one_hot],
                        axis=-1)                           # (B, 52)

    out = wide_deep_apply(x, prep, dense_field=dense_field,
                          sparse_field=sparse_field, k=k,
                          assume_one_hot=True, tb_max=2048, target_steps=8)
    out = jax.block_until_ready(out)

    ref = wide_deep_ref(x, params, dense_field, field_feat_nums, k)
    assert out.shape == (B, 1)
    # bf16 MXU operands / f32 accumulation vs. f32 reference -> loose tolerance
    max_err = jnp.max(jnp.abs(out - ref))
    assert jnp.allclose(out, ref, atol=2e-2, rtol=0.0), f"mismatch, max err={max_err}"

    print("KERNEL_OK")
</pallas_src>

<mosaic_0001>
module attributes {stable_mosaic.version = 11 : i64} {
  func.func @wide_deep_kernel(%arg0: i32, %arg1: memref<40x128xbf16, #tpu.memory_space<vmem>>, %arg2: memref<1x128xf32, #tpu.memory_space<vmem>>, %arg3: memref<20x40xbf16, #tpu.memory_space<vmem>>, %arg4: memref<20x1xf32, #tpu.memory_space<vmem>>, %arg5: memref<10x20xbf16, #tpu.memory_space<vmem>>, %arg6: memref<10x1xf32, #tpu.memory_space<vmem>>, %arg7: memref<1x10xbf16, #tpu.memory_space<vmem>>, %arg8: memref<1x128xf32, #tpu.memory_space<vmem>>) attributes {dimension_semantics = [#tpu.dimension_semantics<parallel>], iteration_bounds = array<i64: 4>, scalar_prefetch = 0 : i64, scratch_operands = 0 : i64, tpu.core_type = #tpu.core_type<tc>, window_params = [{transform_indices = @transform_0, window_bounds = array<i64: 40, 128>}, {transform_indices = @transform_1, window_bounds = array<i64: 1, 128>}, {pipeline_mode = #tpu.pipeline_mode<synchronous>, transform_indices = @transform_2, window_bounds = array<i64: 20, 40>}, {pipeline_mode = #tpu.pipeline_mode<synchronous>, transform_indices = @transform_3, window_bounds = array<i64: 20, 1>}, {pipeline_mode = #tpu.pipeline_mode<synchronous>, transform_indices = @transform_4, window_bounds = array<i64: 10, 20>}, {pipeline_mode = #tpu.pipeline_mode<synchronous>, transform_indices = @transform_5, window_bounds = array<i64: 10, 1>}, {pipeline_mode = #tpu.pipeline_mode<synchronous>, transform_indices = @transform_6, window_bounds = array<i64: 1, 10>}, {transform_indices = @transform_7, window_bounds = array<i64: 1, 128>}]} {
    %c0 = arith.constant 0 : index
    %c0_0 = arith.constant 0 : index
    %0 = vector.load %arg1[%c0, %c0_0] : memref<40x128xbf16, #tpu.memory_space<vmem>>, vector<40x128xbf16>
    %c0_1 = arith.constant 0 : index
    %c0_2 = arith.constant 0 : index
    %1 = vector.load %arg3[%c0_1, %c0_2] : memref<20x40xbf16, #tpu.memory_space<vmem>>, vector<20x40xbf16>
    %cst = arith.constant dense<0.000000e+00> : vector<20x128xf32>
    %2 = tpu.matmul %1, %0, %cst {dimension_numbers = #tpu.dot_dimension_numbers<[1], [0], [0], [1], [0, 0, 1, 1], [], []>} : vector<20x40xbf16>, vector<40x128xbf16>, vector<20x128xf32> -> vector<20x128xf32>
    %c0_3 = arith.constant 0 : index
    %c0_4 = arith.constant 0 : index
    %3 = vector.load %arg4[%c0_3, %c0_4] : memref<20x1xf32, #tpu.memory_space<vmem>>, vector<20x1xf32>
    %4 = vector.broadcast %3 : vector<20x1xf32> to vector<20x128xf32>
    %5 = arith.addf %2, %4 : vector<20x128xf32>
    %cst_5 = arith.constant 0.000000e+00 : f32
    %6 = vector.broadcast %cst_5 : f32 to vector<20x128xf32>
    %7 = arith.maximumf %5, %6 : vector<20x128xf32>
    %8 = arith.truncf %7 : vector<20x128xf32> to vector<20x128xbf16>
    %c0_6 = arith.constant 0 : index
    %c0_7 = arith.constant 0 : index
    %9 = vector.load %arg5[%c0_6, %c0_7] : memref<10x20xbf16, #tpu.memory_space<vmem>>, vector<10x20xbf16>
    %cst_8 = arith.constant dense<0.000000e+00> : vector<10x128xf32>
    %10 = tpu.matmul %9, %8, %cst_8 {dimension_numbers = #tpu.dot_dimension_numbers<[1], [0], [0], [1], [0, 0, 1, 1], [], []>} : vector<10x20xbf16>, vector<20x128xbf16>, vector<10x128xf32> -> vector<10x128xf32>
    %c0_9 = arith.constant 0 : index
    %c0_10 = arith.constant 0 : index
    %11 = vector.load %arg6[%c0_9, %c0_10] : memref<10x1xf32, #tpu.memory_space<vmem>>, vector<10x1xf32>
    %12 = vector.broadcast %11 : vector<10x1xf32> to vector<10x128xf32>
    %13 = arith.addf %10, %12 : vector<10x128xf32>
    %cst_11 = arith.constant 0.000000e+00 : f32
    %14 = vector.broadcast %cst_11 : f32 to vector<10x128xf32>
    %15 = arith.maximumf %13, %14 : vector<10x128xf32>
    %16 = arith.truncf %15 : vector<10x128xf32> to vector<10x128xbf16>
    %c0_12 = arith.constant 0 : index
    %c0_13 = arith.constant 0 : index
    %17 = vector.load %arg7[%c0_12, %c0_13] : memref<1x10xbf16, #tpu.memory_space<vmem>>, vector<1x10xbf16>
    %cst_14 = arith.constant dense<0.000000e+00> : vector<1x128xf32>
    %18 = tpu.matmul %17, %16, %cst_14 {dimension_numbers = #tpu.dot_dimension_numbers<[1], [0], [0], [1], [0, 0, 1, 1], [], []>} : vector<1x10xbf16>, vector<10x128xbf16>, vector<1x128xf32> -> vector<1x128xf32>
    %c0_15 = arith.constant 0 : index
    %c0_16 = arith.constant 0 : index
    %19 = vector.load %arg2[%c0_15, %c0_16] : memref<1x128xf32, #tpu.memory_space<vmem>>, vector<1x128xf32>
    %20 = arith.addf %18, %19 : vector<1x128xf32>
    %21 = arith.negf %20 : vector<1x128xf32>
    %22 = math.exp %21 : vector<1x128xf32>
    %cst_17 = arith.constant 1.000000e+00 : f32
    %23 = vector.broadcast %cst_17 : f32 to vector<1x128xf32>
    %24 = arith.addf %23, %22 : vector<1x128xf32>
    %25 = arith.divf %23, %24 : vector<1x128xf32>
    %c0_18 = arith.constant 0 : index
    %c0_19 = arith.constant 0 : index
    %26 = vector.load %arg8[%c0_18, %c0_19] : memref<1x128xf32, #tpu.memory_space<vmem>>, vector<1x128xf32>
    tpu.vector_store %arg8[%c0_18, %c0_19], %25 {strides = array<i32>} : memref<1x128xf32, #tpu.memory_space<vmem>>, vector<1x128xf32>,
    return
  }
  func.func @transform_0(%arg0: i32) -> (i32, i32) {
    %c0_i32 = arith.constant 0 : i32
    %c0_i32_0 = arith.constant 0 : i32
    return %c0_i32, %arg0 : i32, i32
  }
  func.func @transform_1(%arg0: i32) -> (i32, i32) {
    %c0_i32 = arith.constant 0 : i32
    %c0_i32_0 = arith.constant 0 : i32
    return %c0_i32, %arg0 : i32, i32
  }
  func.func @transform_2(%arg0: i32) -> (i32, i32) {
    %c0_i32 = arith.constant 0 : i32
    %c0_i32_0 = arith.constant 0 : i32
    %c0_i32_1 = arith.constant 0 : i32
    return %c0_i32, %c0_i32_0 : i32, i32
  }
  func.func @transform_3(%arg0: i32) -> (i32, i32) {
    %c0_i32 = arith.constant 0 : i32
    %c0_i32_0 = arith.constant 0 : i32
    %c0_i32_1 = arith.constant 0 : i32
    return %c0_i32, %c0_i32_0 : i32, i32
  }
  func.func @transform_4(%arg0: i32) -> (i32, i32) {
    %c0_i32 = arith.constant 0 : i32
    %c0_i32_0 = arith.constant 0 : i32
    %c0_i32_1 = arith.constant 0 : i32
    return %c0_i32, %c0_i32_0 : i32, i32
  }
  func.func @transform_5(%arg0: i32) -> (i32, i32) {
    %c0_i32 = arith.constant 0 : i32
    %c0_i32_0 = arith.constant 0 : i32
    %c0_i32_1 = arith.constant 0 : i32
    return %c0_i32, %c0_i32_0 : i32, i32
  }
  func.func @transform_6(%arg0: i32) -> (i32, i32) {
    %c0_i32 = arith.constant 0 : i32
    %c0_i32_0 = arith.constant 0 : i32
    %c0_i32_1 = arith.constant 0 : i32
    return %c0_i32, %c0_i32_0 : i32, i32
  }
  func.func @transform_7(%arg0: i32) -> (i32, i32) {
    %c0_i32 = arith.constant 0 : i32
    %c0_i32_0 = arith.constant 0 : i32
    return %c0_i32, %arg0 : i32, i32
  }
}

</mosaic_0001>

<bundles_post_ra>
// kernel: wide_deep_apply.1
= control target key start
LH: loop header
LB: loop body
LE: loop exit
PB: predicated region body
PF: predicated region fallthrough
CT: control target
= control target key end

     0   :  { %s812_s24 = smov 0   ;;  %s814_s25 = smov 0   ;;  %s900_s0 = inlined_call_operand.vmem [shape: bf16[40,512], index: 0, kind: input, shape index: {}]   ;;  %s901_s1 = inlined_call_operand.vmem [shape: f32[1,512], index: 1, kind: input, shape index: {}]   ;;  %s902_s2 = inlined_call_operand.vmem [shape: bf16[20,40], index: 2, kind: input, shape index: {}]   ;;  %s903_s3 = inlined_call_operand.vmem [shape: f32[20,1], index: 3, kind: input, shape index: {}]   ;;  %s904_s4 = inlined_call_operand.vmem [shape: bf16[10,20], index: 4, kind: input, shape index: {}]   ;;  %s905_s5 = inlined_call_operand.vmem [shape: f32[10,1], index: 5, kind: input, shape index: {}]   ;;  %s906_s6 = inlined_call_operand.vmem [shape: bf16[1,10], index: 6, kind: input, shape index: {}]   ;;  %s907_s7 = inlined_call_operand.vmem [shape: f32[1,512], index: 7, kind: output, shape index: {}]  }
   0x1   :  { %s816_s26 = smov 0  }
   0x2 LB: > { %s650_s27 = sadd.s32 4294967295, %s767_s26   ;;  %s829_s28 = sadd.s32 1, %s767_s26   ;;  %s767_s26 = sphi %s816_s26, %s910_s26   ;;  %s763_s25 = sphi %s814_s25, %s909_s25   ;;  %s759_s24 = sphi %s812_s24, %s908_s24  }
   0x3   : > { %s21_s29 = ssub.s32 %s767_s26, %s829_s28  ;;  %s24_s30 = sadd.s32 1, %s763_s25 }
   0x4   : > { %p22_p0 = scmp.eq.s32.totalorder %s21_s29, 0  ;;  %p31_p1 = scmp.ne.s32.totalorder %s763_s25, %s759_s24 }
   0x5   : > { %p32_p2 = scmp.eq.s32.totalorder %s767_s26, 0  ;;  %p653_p4 = scmp.ge.s32.totalorder %s767_s26, 4 }
   0x6   : > { %s838_s8 = scalar_select %p22_p0, %s763_s25, %s24_s30  }
   0x7   : > { %p33_p3 = por %p32_p2, %p31_p1  ;;  %229 = sbr.rel (%p653_p4) target bundleno = 21 (0x15), region = 36 }
   0xe   : > { %232 = sbr.rel (!%p33_p3) target bundleno = 21 (0x15), region = 40  ;;  %s234_s9 = sand.u32 (%p33_p3), 1, %s763_s25  }
   0xf   : > { %s654_s10 = sshll.u32 (%p33_p3), %s767_s26, 2  ;;  %s704_s11 = smul.u32 (%p33_p3), 20, %s234_s9 }
  0x10   : > { %s238_s14 = scalar_lea.vmem (%p33_p3), %s900_s0, %s654_s10 }
  0x11   : > { %v254_v0 = vld [vmem:[%s238_s14] sm:$0xf] (%p33_p3)  ;;  %v256_v1 = vld [vmem:[%s238_s14 + $0x10] sm:$0xf] (%p33_p3)  ;;  %s236_s15 = scalar_lea.vmem (%p33_p3), [#allocation2], %s704_s11 }
  0x12   : > { %v258_v2 = vld [vmem:[%s238_s14 + $0x20] sm:$0xf] (%p33_p3)  ;;  %v260_v3 = vld [vmem:[%s238_s14 + $0x30] sm:$0xf] (%p33_p3)  ;;  %255 = vst [vmem:[%s236_s15] sm:$0xf] (%p33_p3), %v254_v0 }
  0x13   : > { %v262_v4 = vld [vmem:[%s238_s14 + $0x40] sm:$0xf] (%p33_p3)  ;;  %257 = vst [vmem:[%s236_s15 + $0x4] sm:$0xf] (%p33_p3), %v256_v1  ;;  %259 = vst [vmem:[%s236_s15 + $0x8] sm:$0xf] (%p33_p3), %v258_v2 }
  0x14   : > { %261 = vst [vmem:[%s236_s15 + $0xc] sm:$0xf] (%p33_p3), %v260_v3  ;;  %263 = vst [vmem:[%s236_s15 + $0x10] sm:$0xf] (%p33_p3), %v262_v4 }
  0x15 PF: > { %p655_p5 = scmp.ge.s32.totalorder %s767_s26, 1  ;;  %p301_p6 = scmp.lt.s32.totalorder %s767_s26, 5 }
  0x17   : > { %p302_p7 = pnand %p655_p5, %p301_p6 }
  0x18   : > { %s308_s16 = sand.u32 (!%p302_p7), 1, %s759_s24   ;;  %v738_v5 = vld [vmem:[%s902_s2] sm:$0xff] (!%p302_p7)   ;;  %vm396_vm0 = vcmask (!%p302_p7), 326656   ;;  %v769_v6 = vmov (!%p302_p7), 0   ;;  %v356_v8 = vld [vmem:[%s903_s3 + $0x8] sm:$0xff] (!%p302_p7)  ;;  %vm403_vm1 = vcmask (!%p302_p7), 1043456  }
  0x19   : > { %305 = sbr.rel (%p302_p7) target bundleno = 735 (0x2df), region = 85  ;;  %733 = vset.pattern.permute.xlu0 (!%p302_p7), %v769_v6  ;;  %v355_v7 = vld [vmem:[%s903_s3] sm:$0xff] (!%p302_p7)  ;;  %734 = vset.pattern.permute.xlu1 (!%p302_p7), %v769_v6  ;;  %v357_v9 = vld [vmem:[%s903_s3 + $0x10] sm:$0xf] (!%p302_p7)  ;;  %v463_v14 = vld [vmem:[%s905_s5 + $0x8] sm:$0x3] (!%p302_p7) }
  0x1a   : > { %s705_s17 = smul.u32 (!%p302_p7), 20, %s308_s16  ;;  %685 = vmatprep.mubr.msk.bf16.mxu0 (!%p302_p7), %vm396_vm0, %v738_v5  ;;  %360 = vperm.xlu0 (!%p302_p7), %733, %v355_v7   ;;  %v462_v10 = vld [vmem:[%s905_s5] sm:$0xff] (!%p302_p7)  ;;  %v739_v16 = vld [vmem:[%s902_s2 + $0x8] ss:$0 sps:$4 sm:$0x33] (!%p302_p7)   ;;  %v770_v17 = vmov (!%p302_p7), 0.0  }
  0x1b   : > { %370 = vperm.xlu1 (!%p302_p7), %734, %v357_v9   ;;  %689 = vmatprep.subr.bf16.mxu1 (!%p302_p7), %v770_v17  ;;  %vm771_vm2 = vmmov (!%p302_p7), 0   ;;  %vm483_vm3 = vcmask (!%p302_p7), 1041408   ;;  %v740_v34 = vld [vmem:[%s904_s4] sm:$0x1f] (!%p302_p7)   ;;  %vm479_vm4 = vcmask (!%p302_p7), 162816   ;;  %vm537_vm5 = vcmask (!%p302_p7), 1044480  }
  0x1c   : > { %s310_s10 = scalar_lea.vmem (!%p302_p7), [#allocation2], %s705_s17  ;;  %693 = vmatprep.mubr.msk.bf16.mxu1 (!%p302_p7), %vm771_vm2, %v770_v17  ;;  %v531_v47 = vld [vmem:[%s906_s6] sm:$0x1] (!%p302_p7)  ;;  %vm533_vm6 = vcmask (!%p302_p7), 80896   ;;  %p340_p8 = scmp.lt.s32.totalorder (!%p302_p7), %s650_s27, 3 }
  0x1d   : > { %v735_v11 = vld [vmem:[%s310_s10] sm:$0xff] (!%p302_p7)   ;;  %v736_v12 = vld [vmem:[%s310_s10 + $0x8] sm:$0xff] (!%p302_p7)   ;;  %v737_v13 = vld [vmem:[%s310_s10 + $0x10] ss:$0 sps:$4 sm:$0xff] (!%p302_p7)  }
  0x1e   : > { %679 = vmatprep.subr.bf16.mxu0 (!%p302_p7), %v735_v11  ;;  %365 = vperm.xlu0 (!%p302_p7), %733, %v356_v8   ;;  %v405_v15 = vsel (!%p302_p7), %vm403_vm1, %v737_v13, 0 }
  0x1f   : > { %680 = vmatpush3.bf16.msra.mxu0 (!%p302_p7), %v735_v11  ;;  %466 = vperm.xlu1 (!%p302_p7), %734, %v462_v10  }
  0x20   : > { %681 = vmatprep.subr.bf16.mxu0 %v736_v12  ;;  %s912_s27 = smov (!%p340_p8, %s650_s27), 3 }
  0x21   : > { %s342_s21 = scalar_lea.vmem %s901_s1, %s912_s27  ;;  %s345_s26 = scalar_lea.vmem %s907_s7, %s912_s27 }
  0x22   : > { %471 = vperm.xlu0 %733, %v463_v14   ;;  %v532_v48 = vld [vmem:[%s342_s21] sm:$0x1] }
  0x23   : > { %682 = vmatpush3.bf16.msra.mxu0 %v736_v12 }
  0x24   : > { %703 = vmatprep.subr.msk.bf16.mxu0 %vm403_vm1, %v737_v13 }
  0x27   : > { %684 = vmatpush3.bf16.msra.mxu0 %v405_v15 }
  0x2a   : > { %686 = vmatmul.mubr.msk.bf16.vlgmr.msra.gmra.mrb[0].mxu0 %vm396_vm0, %v739_v16 }
  0x99   : > { %v361_v18 = vpop.permute.xlu0 %360 }
  0x9a   : > { %v371_v19 = vpop.permute.xlu1 %370 }
  0x9d   : > { %v366_v25 = vpop.permute.xlu0 %365 }
  0x9e   : > { %v467_v35 = vpop.permute.xlu1 %466 }
  0xa1   : > { %v472_v39 = vpop.permute.xlu0 %471 }
  0xfd   : > { %v687_v20 = vpop.f32.mrb[0].mxu0 }
  0xfe   : > { %v450_v21 = vadd.f32 %v687_v20, %v371_v19  ;;  %v441_v22 = vpop.f32.mrb[1].mxu0 }
  0xff   : > { %v442_v23 = vadd.f32 %v441_v22, %v361_v18  ;;  %v688_v24 = vpop.f32.mrb[2].mxu0 }
 0x100   : > { %v444_v26 = vpop.f32.mrb[3].mxu0  ;;  %v457_v28 = vmax.f32 %v450_v21, 0.0 }
 0x101   : > { %v445_v27 = vadd.f32 %v444_v26, %v366_v25  ;;  %v455_v29 = vmax.f32 %v442_v23, 0.0 }
 0x102   : > { %v459_v32 = vpack.c.bf16 %v457_v28, %v457_v28 }
 0x103   : > { %v456_v30 = vmax.f32 %v445_v27, 0.0 }
 0x104   : > { %v485_v33 = vsel %vm483_vm3, %v459_v32, 0 }
 0x105   : > { %v458_v31 = vpack.c.bf16 %v456_v30, %v455_v29 }
 0x107   : > { %690 = vmatpush3.bf16.msra.mxu1 %v458_v31 }
 0x108   : > { %691 = vmatprep.subr.bf16.mxu1 %v770_v17 }
 0x10b   : > { %692 = vmatpush3.bf16.msra.mxu1 %v485_v33 }
 0x10c   : > { %697 = vmatprep.subr.bf16.mxu1 %v770_v17 }
 0x10e   : > { %694 = vmatmul.mubr.msk.bf16.vlgmr.msra.gmra.mrb[0].mxu1 %vm479_vm4, %v740_v34 }
 0x10f   : > { %699 = vmatprep.mubr.msk.bf16.mxu1 %vm771_vm2, %v770_v17 }
 0x1e1   : > { %v521_v36 = vpop.f32.mrb[0].mxu1 }
 0x1e2   : > { %v522_v37 = vadd.f32 %v521_v36, %v467_v35  ;;  %v695_v38 = vpop.f32.mrb[1].mxu1 }
 0x1e3   : > { %v524_v40 = vpop.f32.mrb[2].mxu1 }
 0x1e4   : > { %v525_v41 = vadd.f32 %v524_v40, %v472_v39  ;;  %v696_v42 = vpop.f32.mrb[3].mxu1  ;;  %v528_v43 = vmax.f32 %v522_v37, 0.0 }
 0x1e6   : > { %v529_v44 = vmax.f32 %v525_v41, 0.0 }
 0x1e8   : > { %v530_v45 = vpack.c.bf16 %v529_v44, %v528_v43 }
 0x1ea   : > { %v539_v46 = vsel %vm537_vm5, %v530_v45, 0 }
 0x1eb   : > { %698 = vmatpush3.bf16.msra.mxu1 %v539_v46 }
 0x1ee   : > { %700 = vmatmul.mubr.msk.bf16.vlgmr.msra.gmra.mrb[4].mxu1 %vm533_vm6, %v531_v47 }
 0x2c1   : > { %v575_v49 = vpop.f32.mrb[4].mxu1 }
 0x2c2   : > { %v576_v50 = vadd.f32 %v575_v49, %v532_v48  ;;  %v701_v51 = vpop.f32.mrb[5].mxu1 }
 0x2c3   : > { %v578_v52 = vpop.f32.mrb[6].mxu1 }
 0x2c4   : > { %v666_v53 = vmul.f32 -1.442695, %v576_v50  ;;  %v702_v54 = vpop.f32.mrb[7].mxu1 }
 0x2c6   : > { %741 = vpow2.f32 %v666_v53 }
 0x2d0   : > { %v742_v55 = vpop.eup %741 }
 0x2d1   : > { %v584_v56 = vadd.f32 1.0, %v742_v55 }
 0x2d3   : > { %743 = vrcp.f32 %v584_v56 }
 0x2dd   : > { %v744_v57 = vpop.eup %743 }
 0x2de   : > { %587 = vst [vmem:[%s345_s26] sm:$0x1] %v744_v57 }
 0x2df PF: > { %p14_p9 = scmp.ge.s32.totalorder %s829_s28, 6   ;;  %s908_s24 = smov %s763_s25 }
 0x2e0   : > { %s909_s25 = smov %s838_s8  ;;  %s910_s26 = smov %s829_s28 }
 0x2e1   :  { %16 = sbr.rel (!%p14_p9) target bundleno = 2 (0x2), region = 127 }

</bundles_post_ra>
